<compile_context>
chip_gen: v5e
topology: v5e:2x2
jax: 0.10.0
libtpu: 0.0.40
codegen_flags: <defaults>
</compile_context>

<pallas_src>
import jax
import jax.numpy as jnp
from jax.experimental import pallas as pl
from jax.experimental.pallas import tpu as pltpu

BN_EPS = 1e-5


# ----------------------------------------------------------------------------
# Kernel
# ----------------------------------------------------------------------------
def embedding_model_kernel(
    x_ref,    # (TN, C, HW)    activation tile, f32 (native), HW on lanes
    w1_ref,   # (C,  M_pad)    fused GAP->feat-Linear->emb-Linear1->BN weight
    b1_ref,   # (1,  M_pad)    fused bias/shift, f32
    w2_ref,   # (M_pad, E_pad) emb Linear #2, compute dtype
    out_ref,  # (TN, E_pad)    output tile
):
    # --- global average pool: 1/HW is folded into w1, so this is a plain sum
    #     over the lane (HW) axis, done in f32 on the XLU (no big-tile cast).
    pooled = jnp.sum(x_ref[...], axis=-1)                   # (TN, C), f32

    # --- fused feature-Linear + (identity dropout) + emb Linear#1 + BN ---
    h = (
        jnp.dot(pooled.astype(w1_ref.dtype), w1_ref[...],
                preferred_element_type=jnp.float32)
        + b1_ref[...]
    )                                                        # (TN, M_pad), f32
    h = jnp.maximum(h, 0.0)                                  # ReLU

    # --- emb Linear #2 -> Tanh ---
    out = jnp.tanh(
        jnp.dot(h.astype(w2_ref.dtype), w2_ref[...],
                preferred_element_type=jnp.float32)
    )                                                        # (TN, E_pad), f32
    out_ref[...] = out.astype(out_ref.dtype)


# ----------------------------------------------------------------------------
# Parameter preparation: fold GAP scale + feature Linear + Linear#1 + BN,
# zero-pad middle / emb dims to multiples of 128 (lane-dense MXU + vst).
# ----------------------------------------------------------------------------
def _round_up(x, m):
    return ((x + m - 1) // m) * m


def prepare_kernel_params(params, hw, compute_dtype):
    C, E = params["wf"].shape
    M = params["w1"].shape[1]
    E_pad = _round_up(E, 128)
    M_pad = _round_up(M, 128)

    # Eval-mode BatchNorm1d fold into Linear #1.
    inv_std = jax.lax.rsqrt(params["var"] + BN_EPS)               # (1, M)
    scale = params["gamma"] * inv_std                             # (1, M)
    w1s = params["w1"] * scale                                    # (E, M)
    bn_shift = params["beta"] - params["mean"] * scale            # (1, M)

    # No nonlinearity between the feature Linear and emb Linear#1 (dropout is
    # identity in eval), so fold the two matmuls and the 1/HW pooling scale:
    #   h = ((pool(x)/HW) @ wf + bf) @ w1s + bn_shift
    #     =  pool(x) @ (wf @ w1s / HW) + (bf @ w1s + bn_shift)
    w_f1 = (params["wf"] @ w1s) / float(hw)                       # (C, M)
    b_f1 = params["bf"] @ w1s + bn_shift                          # (1, M)
    w2 = params["w2"]                                             # (M, E)

    # Zero-pad M/E to multiples of 128: padded lanes stay exactly 0 through
    # ReLU (relu(0)=0), Linear#2 (zero rows/cols) and Tanh (tanh(0)=0), and
    # are sliced off in the wrapper.
    w1_k = jnp.pad(w_f1, ((0, 0), (0, M_pad - M))).astype(compute_dtype)
    b1_k = jnp.pad(b_f1, ((0, 0), (0, M_pad - M))).astype(jnp.float32)
    w2_k = jnp.pad(w2, ((0, M_pad - M), (0, E_pad - E))).astype(compute_dtype)
    return {"w1": w1_k, "b1": b1_k, "w2": w2_k,
            "E": E, "E_pad": E_pad, "M_pad": M_pad}


# ----------------------------------------------------------------------------
# VMEM budgeting (per-TensorCore, generation-conservative) and tile sizing
# ----------------------------------------------------------------------------
def _vmem_budget_bytes():
    cap = 64 * 1024 * 1024
    try:
        cap = int(pltpu.get_tpu_info().vmem_capacity_bytes)
    except Exception:
        pass
    # Treat the budget as per-TensorCore: v7x has 64 MiB per core and the
    # reported figure may be chip-level.  Cap at 64 MiB and take 70% headroom;
    # this is safe on v5e/v6e/v7x and still large enough to put TN well past
    # the ~512-row roofline knee for realistic shapes.
    cap = min(cap, 64 * 1024 * 1024)
    return int(cap * 0.7)


def _choose_tile_n(n, c, hw, m_pad, e_pad, w_itemsize, out_itemsize, budget):
    c_pad = _round_up(c, 8)        # sublane padding of the x tile / w1 rows
    hw_pad = _round_up(hw, 128)    # lane padding of the x tile

    # Resident weights: constant index_map, but still double-buffered by the
    # default pipeline (count 2x).  b_f1 (1, M_pad) pads to 8 sublanes in f32.
    weight_bytes = 2 * ((c_pad * m_pad + m_pad * e_pad) * w_itemsize
                        + 8 * m_pad * 4)
    # Per batch-row VMEM: native-f32 x block (lane/sublane padded) and the
    # output block, both double-buffered.
    per_row = 2 * c_pad * hw_pad * 4 + 2 * e_pad * out_itemsize

    avail = budget - weight_bytes
    if avail <= per_row * 8:
        tn = 8                               # weights nearly fill VMEM
    else:
        tn = (avail // per_row) // 8 * 8     # lands >=256 for realistic configs
    tn = min(tn, 1024)                       # roofline knee ~512; cap DMA chunk
    # Keep >=2 grid steps when the batch allows it, so both TensorCores get
    # work under dimension_semantics=("parallel",) on v7x.
    tn = min(tn, max(8, _round_up((n + 1) // 2, 8)))
    tn = min(tn, _round_up(n, 8))
    return max(8, int(tn))


# ----------------------------------------------------------------------------
# Wrapper
# ----------------------------------------------------------------------------
def embedding_model_forward(x_nchw, params, *, compute_dtype=jnp.bfloat16,
                            out_dtype=jnp.float32, tile_n=None):
    """x_nchw: (N, C, H, W) float32. Returns (N, emb_size) float32."""
    N, C, H, W = x_nchw.shape
    HW = H * W

    kp = prepare_kernel_params(params, HW, compute_dtype)
    E, E_pad, M_pad = kp["E"], kp["E_pad"], kp["M_pad"]

    # (N, C, H, W) -> (N, C, HW): free contiguous reshape.  No transpose and
    # no dtype-cast pass: x is DMA'd in native f32 and pooled in f32 in-kernel.
    x = x_nchw.reshape(N, C, HW)

    w_itemsize = jnp.dtype(compute_dtype).itemsize
    out_itemsize = jnp.dtype(out_dtype).itemsize
    budget = _vmem_budget_bytes()
    TN = int(tile_n) if tile_n is not None else _choose_tile_n(
        N, C, HW, M_pad, E_pad, w_itemsize, out_itemsize, budget)

    N_pad = _round_up(N, TN)
    if N_pad != N:
        x = jnp.pad(x, ((0, N_pad - N), (0, 0), (0, 0)))
    grid = (N_pad // TN,)

    cost = pl.CostEstimate(
        flops=N_pad * C * HW                          # pooling adds
        + 2 * N_pad * (C * M_pad + M_pad * E_pad),    # two MXU passes
        transcendentals=N_pad * E_pad,                # tanh
        bytes_accessed=N_pad * C * HW * 4
        + (kp["w1"].size + kp["w2"].size) * w_itemsize + kp["b1"].size * 4
        + N_pad * E_pad * out_itemsize,
    )

    out = pl.pallas_call(
        embedding_model_kernel,
        out_shape=jax.ShapeDtypeStruct((N_pad, E_pad), out_dtype),
        grid=grid,
        in_specs=[
            pl.BlockSpec((TN, C, HW), lambda i: (i, 0, 0)),      # x tiles (f32)
            pl.BlockSpec((C, M_pad), lambda i: (0, 0)),          # fused w1 (resident)
            pl.BlockSpec((1, M_pad), lambda i: (0, 0)),          # fused bias
            pl.BlockSpec((M_pad, E_pad), lambda i: (0, 0)),      # w2 (resident)
        ],
        out_specs=pl.BlockSpec((TN, E_pad), lambda i: (i, 0)),
        compiler_params=pltpu.CompilerParams(
            dimension_semantics=("parallel",),
            vmem_limit_bytes=budget,
        ),
        cost_estimate=cost,
    )(x, kp["w1"], kp["b1"], kp["w2"])

    return out[:N, :E].astype(jnp.float32)


# ----------------------------------------------------------------------------
# Pure-JAX reference (unfolded params, f32) for correctness checking
# ----------------------------------------------------------------------------
def reference_forward(x_nchw, params):
    pooled = jnp.mean(x_nchw, axis=(2, 3))
    feats = pooled @ params["wf"] + params["bf"]
    h = feats @ params["w1"]
    h = (h - params["mean"]) / jnp.sqrt(params["var"] + BN_EPS)
    h = h * params["gamma"] + params["beta"]
    h = jnp.maximum(h, 0.0)
    return jnp.tanh(h @ params["w2"])


def make_params(key, channels, emb_size, middle):
    ks = jax.random.split(key, 7)
    params = {
        # feature extractor projection (stand-in backbone head), (in, out)
        "wf": jax.random.normal(ks[0], (channels, emb_size), jnp.float32) * 0.1,
        "bf": jax.random.normal(ks[1], (1, emb_size), jnp.float32) * 0.1,
        # emb head: Linear(emb, middle, bias=False) stored as (in, out)
        "w1": jax.random.normal(ks[2], (emb_size, middle), jnp.float32) * 0.1,
        # BatchNorm1d(middle, affine=True), eval-mode running stats
        "gamma": 1.0 + 0.1 * jax.random.normal(ks[3], (1, middle), jnp.float32),
        "beta": 0.1 * jax.random.normal(ks[4], (1, middle), jnp.float32),
        "mean": 0.05 * jax.random.normal(ks[5], (1, middle), jnp.float32),
        "var": jnp.abs(1.0 + 0.1 * jax.random.normal(ks[6], (1, middle), jnp.float32)),
    }
    # emb head: Linear(middle, emb, bias=False) stored as (in, out)
    params["w2"] = (
        jax.random.normal(jax.random.fold_in(key, 99), (middle, emb_size), jnp.float32)
        * 0.1
    )
    return params


if __name__ == "__main__":
    # Small shapes consistent with the module: image input NCHW, emb_size, middle.
    N, C, H, W = 2, 4, 16, 16
    EMB_SIZE, MIDDLE = 32, 16

    key = jax.random.PRNGKey(0)
    kx, kp = jax.random.split(key)
    x = jax.random.normal(kx, (N, C, H, W), jnp.float32)
    params = make_params(kp, C, EMB_SIZE, MIDDLE)

    ref = reference_forward(x, params)

    # f32 weights: tight check (folded matmuls/BN/1-over-HW must match closely).
    out_f32 = jax.block_until_ready(
        embedding_model_forward(x, params, compute_dtype=jnp.float32))
    assert out_f32.shape == (N, EMB_SIZE)
    assert jnp.allclose(out_f32, ref, atol=5e-4, rtol=5e-4)

    # bf16 matmul operands (f32 accumulation / elementwise): relaxed tolerance.
    out_bf16 = jax.block_until_ready(
        embedding_model_forward(x, params, compute_dtype=jnp.bfloat16))
    assert out_bf16.shape == (N, EMB_SIZE)
    assert jnp.allclose(out_bf16, ref, atol=6e-2, rtol=6e-2)

    print("KERNEL_OK")
</pallas_src>

<mosaic_0001>
module attributes {stable_mosaic.version = 11 : i64} {
  func.func @embedding_model_kernel(%arg0: i32, %arg1: memref<8x4x256xf32, #tpu.memory_space<vmem>>, %arg2: memref<4x128xf32, #tpu.memory_space<vmem>>, %arg3: memref<1x128xf32, #tpu.memory_space<vmem>>, %arg4: memref<128x128xf32, #tpu.memory_space<vmem>>, %arg5: memref<8x128xf32, #tpu.memory_space<vmem>>) attributes {dimension_semantics = [#tpu.dimension_semantics<parallel>], iteration_bounds = array<i64: 1>, scalar_prefetch = 0 : i64, scratch_operands = 0 : i64, tpu.core_type = #tpu.core_type<tc>, window_params = [{transform_indices = @transform_0, window_bounds = array<i64: 8, 4, 256>}, {pipeline_mode = #tpu.pipeline_mode<synchronous>, transform_indices = @transform_1, window_bounds = array<i64: 4, 128>}, {pipeline_mode = #tpu.pipeline_mode<synchronous>, transform_indices = @transform_2, window_bounds = array<i64: 1, 128>}, {pipeline_mode = #tpu.pipeline_mode<synchronous>, transform_indices = @transform_3, window_bounds = array<i64: 128, 128>}, {transform_indices = @transform_4, window_bounds = array<i64: 8, 128>}]} {
    %c0 = arith.constant 0 : index
    %c0_0 = arith.constant 0 : index
    %c0_1 = arith.constant 0 : index
    %0 = vector.load %arg1[%c0, %c0_0, %c0_1] : memref<8x4x256xf32, #tpu.memory_space<vmem>>, vector<8x4x256xf32>
    %cst = arith.constant dense<0.000000e+00> : vector<8x4xf32>
    %1 = vector.multi_reduction <add>, %0, %cst [2] : vector<8x4x256xf32> to vector<8x4xf32>
    %c0_2 = arith.constant 0 : index
    %c0_3 = arith.constant 0 : index
    %2 = vector.load %arg2[%c0_2, %c0_3] : memref<4x128xf32, #tpu.memory_space<vmem>>, vector<4x128xf32>
    %cst_4 = arith.constant dense<0.000000e+00> : vector<8x128xf32>
    %3 = tpu.matmul %1, %2, %cst_4 {dimension_numbers = #tpu.dot_dimension_numbers<[1], [0], [0], [1], [0, 0, 1, 1], [], []>} : vector<8x4xf32>, vector<4x128xf32>, vector<8x128xf32> -> vector<8x128xf32>
    %c0_5 = arith.constant 0 : index
    %c0_6 = arith.constant 0 : index
    %4 = vector.load %arg3[%c0_5, %c0_6] : memref<1x128xf32, #tpu.memory_space<vmem>>, vector<1x128xf32>
    %5 = vector.broadcast %4 : vector<1x128xf32> to vector<8x128xf32>
    %6 = arith.addf %3, %5 : vector<8x128xf32>
    %cst_7 = arith.constant 0.000000e+00 : f32
    %7 = vector.broadcast %cst_7 : f32 to vector<8x128xf32>
    %8 = arith.maximumf %6, %7 : vector<8x128xf32>
    %c0_8 = arith.constant 0 : index
    %c0_9 = arith.constant 0 : index
    %9 = vector.load %arg4[%c0_8, %c0_9] : memref<128x128xf32, #tpu.memory_space<vmem>>, vector<128x128xf32>
    %cst_10 = arith.constant dense<0.000000e+00> : vector<8x128xf32>
    %10 = tpu.matmul %8, %9, %cst_10 {dimension_numbers = #tpu.dot_dimension_numbers<[1], [0], [0], [1], [0, 0, 1, 1], [], []>} : vector<8x128xf32>, vector<128x128xf32>, vector<8x128xf32> -> vector<8x128xf32>
    %11 = math.tanh %10 : vector<8x128xf32>
    %c0_11 = arith.constant 0 : index
    %c0_12 = arith.constant 0 : index
    %12 = vector.load %arg5[%c0_11, %c0_12] : memref<8x128xf32, #tpu.memory_space<vmem>>, vector<8x128xf32>
    tpu.vector_store %arg5[%c0_11, %c0_12], %11 {strides = array<i32>} : memref<8x128xf32, #tpu.memory_space<vmem>>, vector<8x128xf32>,
    return
  }
  func.func @transform_0(%arg0: i32) -> (i32, i32, i32) {
    %c0_i32 = arith.constant 0 : i32
    %c0_i32_0 = arith.constant 0 : i32
    %c0_i32_1 = arith.constant 0 : i32
    return %arg0, %c0_i32, %c0_i32_0 : i32, i32, i32
  }
  func.func @transform_1(%arg0: i32) -> (i32, i32) {
    %c0_i32 = arith.constant 0 : i32
    %c0_i32_0 = arith.constant 0 : i32
    %c0_i32_1 = arith.constant 0 : i32
    return %c0_i32, %c0_i32_0 : i32, i32
  }
  func.func @transform_2(%arg0: i32) -> (i32, i32) {
    %c0_i32 = arith.constant 0 : i32
    %c0_i32_0 = arith.constant 0 : i32
    %c0_i32_1 = arith.constant 0 : i32
    return %c0_i32, %c0_i32_0 : i32, i32
  }
  func.func @transform_3(%arg0: i32) -> (i32, i32) {
    %c0_i32 = arith.constant 0 : i32
    %c0_i32_0 = arith.constant 0 : i32
    %c0_i32_1 = arith.constant 0 : i32
    return %c0_i32, %c0_i32_0 : i32, i32
  }
  func.func @transform_4(%arg0: i32) -> (i32, i32) {
    %c0_i32 = arith.constant 0 : i32
    %c0_i32_0 = arith.constant 0 : i32
    return %arg0, %c0_i32 : i32, i32
  }
}

</mosaic_0001>

<bundles_post_ra>
// kernel: tpu_custom_call.1
= control target key start
LH: loop header
LB: loop body
LE: loop exit
PB: predicated region body
PF: predicated region fallthrough
CT: control target
= control target key end

     0   :  { %9 = vsyncpa [#allocation3], 0  ;;  %s459_s0 = inlined_call_operand.hbm [shape: f32[8,4,256], index: 0, kind: input, shape index: {}]   ;;  %s460_s1 = inlined_call_operand.hbm [shape: f32[4,128], index: 1, kind: input, shape index: {}]   ;;  %s461_s2 = inlined_call_operand.vmem [shape: f32[1,128], index: 2, kind: input, shape index: {}]   ;;  %s462_s3 = inlined_call_operand.hbm [shape: f32[128,128], index: 3, kind: input, shape index: {}]   ;;  %s463_s4 = inlined_call_operand.hbm [shape: f32[8,128], index: 4, kind: output, shape index: {}]  }
   0x1   :  { %10 = vsyncpa [#allocation6], 0  ;;  %s30_s17 = sshll.u32 %s460_s1, 4  ;;  %s31_s17 = int_to_ptr.hbm [resolvable:$true] %s30_s17 }
   0x2   :  { %11 = vsyncpa [#allocation4], 0  ;;  %s396_s18 = smov [#allocation5]   ;;  %s16_s22 = sshll.u32 %s459_s0, 4  ;;  %s17_s22 = int_to_ptr.hbm [resolvable:$true] %s16_s22 }
   0x3   :  { %s32_s19 = sshll.u32 %s396_s18, 4  ;;  %s397_s23 = smov [#allocation2]   ;;  %s33_s19 = int_to_ptr.vmem [resolvable:$true] %s32_s19 }
   0x4   :  { %35 = dma.hbm_to_vmem [thread:$0]  %s31_s17, 64, %s33_s19, [#allocation6]  }
   0x5   :  { %s18_s24 = sshll.u32 %s397_s23, 4  ;;  %s398_s25 = smov 128   ;;  %s19_s24 = int_to_ptr.vmem [resolvable:$true] %s18_s24 }
   0x6   :  { %s399_s26 = smov 8   ;;  %s42_s1 = sshll.u32 %s462_s3, 4  ;;  %s43_s1 = int_to_ptr.hbm [resolvable:$true] %s42_s1 }
   0x7   :  { %24 = dma.hbm_to_vmem [thread:$0]  %s17_s22, 1024, %s19_s24, [#allocation3], %s398_s25, %s398_s25, %s399_s26  }
   0x8   :  { %s400_s29 = smov [#allocation7]  }
   0x9   :  { %s44_s30 = sshll.u32 %s400_s29, 4  ;;  %s45_s30 = int_to_ptr.vmem [resolvable:$true] %s44_s30 }
   0xa   :  { %50 = dma.hbm_to_vmem [thread:$0]  %s43_s1, 2048, %s45_s30, [#allocation6], %s398_s25, %s398_s25, %s399_s26  }
   0xb   :  { %390 = dma.done.wait [#allocation3], 1024  }
   0xc   :  { %391 = vsyncadd [#allocation3], 4294966272 }
   0xd   :  { %392 = dma.done.wait [#allocation6], 2112  }
   0xe   :  { %393 = vsyncadd [#allocation6], 4294965184  ;;  %v63_v0 = vld [vmem:[#allocation2] sm:$0xff]  ;;  %v65_v1 = vld [vmem:[#allocation2 + $0x10] sm:$0xff]  ;;  %vm122_vm0 = vcmask 1043456   ;;  %v176_v57 = vlaneseq  ;;  %vm186_vm1 = vcmask 1041409  }
   0xf   :  { %79 = vst [vmem:[#allocation1] ss:$2 sm:$0xff] %v63_v0  ;;  %v64_v2 = vld [vmem:[#allocation2 + $0x8] sm:$0xff]  ;;  %v66_v3 = vld [vmem:[#allocation2 + $0x18] sm:$0xff]  ;;  %v67_v4 = vld [vmem:[#allocation2 + $0x20] sm:$0xff]  ;;  %vm188_vm2 = vcmask 1042434  }
  0x10   :  { %87 = vst [vmem:[#allocation1 + $0x20] ss:$2 sm:$0xff] %v65_v1  ;;  %v69_v5 = vld [vmem:[#allocation2 + $0x30] sm:$0xff]  ;;  %v68_v10 = vld [vmem:[#allocation2 + $0x28] sm:$0xff]  ;;  %v70_v16 = vld [vmem:[#allocation2 + $0x38] sm:$0xff]  ;;  %v177_v61 = vand.u32 127, %v176_v57 }
  0x11   :  { %83 = vst [vmem:[#allocation1 + $0x10] ss:$2 sm:$0xff] %v64_v2  ;;  %v163_v48 = vld [vmem:[#allocation5] sm:$0xf]  ;;  %v241_v50 = vld [vmem:[#allocation7 + $0x70] sm:$0xff]  ;;  %v240_v51 = vld [vmem:[#allocation7 + $0x68] sm:$0xff] }
  0x12   :  { %91 = vst [vmem:[#allocation1 + $0x30] ss:$2 sm:$0xff] %v66_v3  ;;  %283 = vmatpush.msk.msra.mxu0 %vm122_vm0, %v163_v48  ;;  %v242_v49 = vld [vmem:[#allocation7 + $0x78] sm:$0xff]  ;;  %v239_v52 = vld [vmem:[#allocation7 + $0x60] sm:$0xff]  ;;  %v237_v54 = vld [vmem:[#allocation7 + $0x50] sm:$0xff]  ;;  %vm190_vm3 = vcmask 1043459  }
  0x13   :  { %243 = vmatpush.msra.mxu1 %v242_v49  ;;  %v238_v53 = vld [vmem:[#allocation7 + $0x58] sm:$0xff]  ;;  %v236_v56 = vld [vmem:[#allocation7 + $0x48] sm:$0xff]  ;;  %v235_v59 = vld [vmem:[#allocation7 + $0x40] sm:$0xff]  ;;  %vm192_vm4 = vcmask 1044484   ;;  %vm194_vm5 = vcmask 1045509   ;;  %vm196_vm6 = vcmask 1046534  }
  0x14   :  { %v234_v60 = vld [vmem:[#allocation7 + $0x38] sm:$0xff]  ;;  %v233_v62 = vld [vmem:[#allocation7 + $0x30] sm:$0xff]  ;;  %v232_v1 = vld [vmem:[#allocation7 + $0x28] sm:$0xff]  ;;  %vm198_vm7 = vcmask 1047559   ;;  %vm200_vm8 = vcmask 31744   ;;  %s401_s5 = smov [#allocation8]  }
  0x15   :  { %244 = vmatpush.msra.mxu1 %v241_v50  ;;  %s270_s6 = sshll.u32 %s401_s5, 4  ;;  %s272_s9 = sshll.u32 %s463_s4, 4  ;;  %s271_s6 = int_to_ptr.vmem [resolvable:$true] %s270_s6  ;;  %s273_s9 = int_to_ptr.hbm [resolvable:$true] %s272_s9 }
  0x16   :  { %v80_v6 = vld.sshfl [vmem:[#allocation1] sm:$0xff pattern:$0x75316420]  ;;  %v81_v7 = vld.sshfl [vmem:[#allocation1 + $0x8] sm:$0xff pattern:$0x75316420] }
  0x17   :  { %v123_v8 = vsel %vm122_vm0, %v80_v6, 0.0  ;;  %v124_v9 = vsel %vm122_vm0, %v81_v7, 0.0  ;;  %94 = vst [vmem:[#allocation1] ss:$2 sm:$0xff] %v67_v4  ;;  %245 = vmatpush.msra.mxu1 %v240_v51  ;;  %v231_v6 = vld [vmem:[#allocation7 + $0x20] sm:$0xff] }
  0x18   :  { %v125_v11 = vadd.f32 %v124_v9, %v123_v8  ;;  %v88_v12 = vld.sshfl [vmem:[#allocation1 + $0x20] sm:$0xff pattern:$0x75316420]  ;;  %v89_v13 = vld.sshfl [vmem:[#allocation1 + $0x28] sm:$0xff pattern:$0x75316420] }
  0x19   :  { %v133_v14 = vsel %vm122_vm0, %v88_v12, 0.0  ;;  %v134_v15 = vsel %vm122_vm0, %v89_v13, 0.0  ;;  %100 = vst [vmem:[#allocation1 + $0x20] ss:$2 sm:$0xff] %v69_v5  ;;  %246 = vmatpush.msra.mxu1 %v239_v52 }
  0x1a   :  { %126 = vadd.xlane.f32.xlu0 %v125_v11  ;;  %v135_v17 = vadd.f32 %v134_v15, %v133_v14  ;;  %v84_v18 = vld.sshfl [vmem:[#allocation1 + $0x10] sm:$0xff pattern:$0x75316420]  ;;  %v85_v19 = vld.sshfl [vmem:[#allocation1 + $0x18] sm:$0xff pattern:$0x75316420] }
  0x1b   :  { %97 = vst [vmem:[#allocation1 + $0x10] ss:$2 sm:$0xff] %v68_v10  ;;  %v128_v20 = vsel %vm122_vm0, %v84_v18, 0.0  ;;  %v129_v21 = vsel %vm122_vm0, %v85_v19, 0.0  ;;  %247 = vmatpush.msra.mxu1 %v238_v53  ;;  %v230_v10 = vld [vmem:[#allocation7 + $0x18] sm:$0xff] }
  0x1c   :  { %136 = vadd.xlane.f32.xlu1 %v135_v17  ;;  %v92_v22 = vld.sshfl [vmem:[#allocation1 + $0x30] sm:$0xff pattern:$0x75316420]  ;;  %v93_v23 = vld.sshfl [vmem:[#allocation1 + $0x38] sm:$0xff pattern:$0x75316420]  ;;  %v130_v26 = vadd.f32 %v129_v21, %v128_v20 }
  0x1d   :  { %103 = vst [vmem:[#allocation1 + $0x30] ss:$2 sm:$0xff] %v70_v16  ;;  %v138_v24 = vsel %vm122_vm0, %v92_v22, 0.0  ;;  %v139_v25 = vsel %vm122_vm0, %v93_v23, 0.0  ;;  %248 = vmatpush.msra.mxu1 %v237_v54  ;;  %v229_v23 = vld [vmem:[#allocation7 + $0x10] sm:$0xff] }
  0x1e   :  { %v95_v27 = vld.sshfl [vmem:[#allocation1] sm:$0xff pattern:$0x75316420]  ;;  %v96_v28 = vld.sshfl [vmem:[#allocation1 + $0x8] sm:$0xff pattern:$0x75316420]  ;;  %v140_v32 = vadd.f32 %v139_v25, %v138_v24 }
  0x1f   :  { %v143_v29 = vsel %vm122_vm0, %v95_v27, 0.0  ;;  %v144_v30 = vsel %vm122_vm0, %v96_v28, 0.0  ;;  %249 = vmatpush.msra.mxu1 %v236_v56  ;;  %v228_v24 = vld [vmem:[#allocation7 + $0x8] sm:$0xff]  ;;  %v227_v25 = vld [vmem:[#allocation7] sm:$0xff] }
  0x20   :  { %v145_v31 = vadd.f32 %v144_v30, %v143_v29  ;;  %v101_v33 = vld.sshfl [vmem:[#allocation1 + $0x20] sm:$0xff pattern:$0x75316420]  ;;  %v102_v34 = vld.sshfl [vmem:[#allocation1 + $0x28] sm:$0xff pattern:$0x75316420] }
  0x21   :  { %v153_v39 = vsel %vm122_vm0, %v101_v33, 0.0  ;;  %v154_v40 = vsel %vm122_vm0, %v102_v34, 0.0  ;;  %250 = vmatpush.msra.mxu1 %v235_v59 }
  0x22   :  { %131 = vadd.xlane.f32.xlu0 %v130_v26  ;;  %146 = vadd.xlane.f32.xlu2 %v145_v31  ;;  %v98_v35 = vld.sshfl [vmem:[#allocation1 + $0x10] sm:$0xff pattern:$0x75316420]  ;;  %v99_v36 = vld.sshfl [vmem:[#allocation1 + $0x18] sm:$0xff pattern:$0x75316420]  ;;  %v155_v46 = vadd.f32 %v154_v40, %v153_v39 }
  0x23   :  { %v148_v37 = vsel %vm122_vm0, %v98_v35, 0.0  ;;  %v149_v38 = vsel %vm122_vm0, %v99_v36, 0.0  ;;  %251 = vmatpush.msra.mxu1 %v234_v60  ;;  %v291_v26 = vld [vmem:[%s461_s2] ss:$0 sm:$0xff] }
  0x24   :  { %141 = vadd.xlane.f32.xlu1 %v140_v32  ;;  %v104_v41 = vld.sshfl [vmem:[#allocation1 + $0x30] sm:$0xff pattern:$0x75316420]  ;;  %v105_v42 = vld.sshfl [vmem:[#allocation1 + $0x38] sm:$0xff pattern:$0x75316420]  ;;  %v150_v45 = vadd.f32 %v149_v38, %v148_v37 }
  0x25   :  { %v158_v43 = vsel %vm122_vm0, %v104_v41, 0.0  ;;  %v159_v44 = vsel %vm122_vm0, %v105_v42, 0.0  ;;  %252 = vmatpush.msra.mxu1 %v233_v62 }
  0x26   :  { %v160_v47 = vadd.f32 %v159_v44, %v158_v43 }
  0x27   :  { %253 = vmatpush.msra.mxu1 %v232_v1 }
  0x29   :  { %254 = vmatpush.msra.mxu1 %v231_v6 }
  0x2a   :  { %151 = vadd.xlane.f32.xlu2 %v150_v45  ;;  %156 = vadd.xlane.f32.xlu0 %v155_v46 }
  0x2b   :  { %255 = vmatpush.msra.mxu1 %v230_v10 }
  0x2c   :  { %161 = vadd.xlane.f32.xlu1 %v160_v47 }
  0x2d   :  { %256 = vmatpush.msra.mxu1 %v229_v23 }
  0x2f   :  { %257 = vmatpush.msra.mxu1 %v228_v24 }
  0x31   :  { %258 = vmatpush.msra.mxu1 %v227_v25 }
  0x8d   :  { %v127_v55 = vpop.xlane.xlu0 %126 }
  0x8e   :  { %v178_v2 = vperm.slane %v127_v55, %v177_v61 }
  0x8f   :  { %v137_v58 = vpop.xlane.xlu1 %136 }
  0x90   :  { %v180_v4 = vperm.slane %v137_v58, %v177_v61 }
  0x95   :  { %v132_v63 = vpop.xlane.xlu0 %131  ;;  %v147_v0 = vpop.xlane.xlu2 %146 }
  0x96   :  { %v179_v3 = vperm.slane %v132_v63, %v177_v61  ;;  %v182_v12 = vperm.slane %v147_v0, %v177_v61 }
  0x97   :  { %v142_v5 = vpop.xlane.xlu1 %141 }
  0x98   :  { %v187_v7 = vsel %vm186_vm1, %v179_v3, %v178_v2  ;;  %v181_v8 = vperm.slane %v142_v5, %v177_v61 }
  0x99   :  { %v189_v9 = vsel %vm188_vm2, %v180_v4, %v187_v7 }
  0x9a   :  { %v191_v11 = vsel %vm190_vm3, %v181_v8, %v189_v9 }
  0x9b   :  { %v193_v17 = vsel %vm192_vm4, %v182_v12, %v191_v11 }
  0x9d   :  { %v152_v13 = vpop.xlane.xlu2 %151  ;;  %v157_v14 = vpop.xlane.xlu0 %156 }
  0x9e   :  { %v183_v15 = vperm.slane %v152_v13, %v177_v61  ;;  %v184_v16 = vperm.slane %v157_v14, %v177_v61 }
  0x9f   :  { %v162_v18 = vpop.xlane.xlu1 %161 }
  0xa0   :  { %v195_v19 = vsel %vm194_vm5, %v183_v15, %v193_v17  ;;  %v185_v20 = vperm.slane %v162_v18, %v177_v61 }
  0xa1   :  { %v197_v21 = vsel %vm196_vm6, %v184_v16, %v195_v19 }
  0xa2   :  { %v199_v22 = vsel %vm198_vm7, %v185_v20, %v197_v21 }
  0xa3   :  { %284 = vmatmul.msk.f32.vlgmr.msra.gmra.mxu0 %vm200_vm8, %v199_v22 }
 0x120   :  { %v223_v27 = vpop.f32.mrf.mxu0 }
 0x121   :  { %v224_v28 = vadd.f32 %v291_v26, %v223_v27 }
 0x123   :  { %v226_v29 = vmax.f32 %v224_v28, 0.0 }
 0x125   :  { %259 = vmatmul.f32.vlgmr.msra.gmra.mxu1 %v226_v29 }
 0x1a2   :  { %v260_v30 = vpop.f32.mrf.mxu1 }
 0x1a3   :  { %292 = vtanh.f32 %v260_v30 }
 0x1a9   :  { %v293_v31 = vpop.eup %292 }
 0x1aa   :  { %264 = vst [vmem:[#allocation8] sm:$0xff] %v293_v31 }
 0x1ab   :  { %275 = dma.vmem_to_hbm [thread:$0]  %s271_s6, 128, %s273_s9, [#allocation4]  }
 0x1ac   :  { %394 = dma.done.wait [#allocation4], 128  }
 0x1ad   :  { %395 = vsyncadd [#allocation4], 4294967168 }
 0x1ae   :  { %280 = vsyncpa [#allocation3], 1 }
 0x1af   :  { %281 = vsyncpa [#allocation6], 1 }
 0x1b0   :  { %282 = vsyncpa [#allocation4], 1 }

</bundles_post_ra>
